<compile_context>
chip_gen: v7x
topology: tpu7x:2x2x1
jax: 0.10.0
libtpu: 0.0.40
codegen_flags: <defaults>
</compile_context>

<pallas_src>
import jax
import jax.numpy as jnp
from jax.experimental import pallas as pl
from jax.experimental.pallas import tpu as pltpu


_LANE = 128
# Budget for the double-buffered X tile + double-buffered output tile.
# Stays well under v5e's 16 MiB scoped-VMEM default and v7x's 32 MiB scoped
# default / 64 MiB physical, while still allowing >=512-lane tiles for
# C up to ~1500 fp32.
_VMEM_TILE_BUDGET = 12 * 1024 * 1024
_MAX_PIXEL_TILE = 2048   # measured gains flatten past ~1-2K lanes


def _ceil_div(a, b):
    return -(-a // b)


def _pick_pixel_tile(hw, c, x_itemsize, o, n_batch):
    """Pick the lane (pixel-axis) tile: VMEM-budget aware, prefers a tile
    that divides hw (no ragged tail), then splits so the grid has >= 4
    steps (v7x megacore sharding / pipeline fill)."""
    per_lane_bytes = 2 * c * x_itemsize + 2 * o * 4   # dbl-buffered X + out
    t_max = max(_LANE, (_VMEM_TILE_BUDGET // per_lane_bytes) // _LANE * _LANE)
    t_max = min(t_max, _MAX_PIXEL_TILE)

    if hw <= t_max:
        t = hw                                   # equals full array dim -> legal
    else:
        t = None
        for granule in (256, _LANE):             # 256 fills 2x256 MXU columns
            start = t_max - (t_max % granule)
            for cand in range(start, 0, -granule):
                if hw % cand == 0:
                    t = cand
                    break
            if t is not None:
                break
        if t is None:
            t = t_max                            # ragged tail; Pallas masks it

    # Guarantee >= 4 grid steps when a legal (multiple-of-128) smaller tile
    # exists; keeps both v7x TensorCores busy on small feature maps.
    while (n_batch * _ceil_div(hw, t) < 4 and t >= 2 * _LANE
           and (t // 2) % _LANE == 0):
        t //= 2
    return t


def _conv1x1_kernel(x_ref, w_ref, b_ref, o_ref):
    # x_ref: (C, t_hw)   w_ref: (O, C)   b_ref: (O, 1)   o_ref: (O, t_hw)
    acc = jnp.dot(w_ref[...], x_ref[...], preferred_element_type=jnp.float32)
    o_ref[...] = (acc + b_ref[...]).astype(o_ref.dtype)


@jax.jit
def class_head_forward(x_nchw, weight, bias):
    """ClassHead forward: nn.Conv2d(C, O, kernel_size=1)(x), NCHW in/out.

    x_nchw : (N, C, H, W)
    weight : (O, C)   -- Conv2d weight with the trailing (1,1) squeezed
    bias   : (O,)
    returns: (N, O, H, W), same dtype as x (fp32 accumulation inside).
    """
    N, C, H, W = x_nchw.shape
    O = weight.shape[0]
    HW = H * W

    x_mat = x_nchw.reshape(N, C, HW)     # free contiguous reshape
    b_col = bias.reshape(O, 1)           # O elements -- effectively free

    t_hw = _pick_pixel_tile(HW, C, x_mat.dtype.itemsize, O, N)
    grid = (N, _ceil_div(HW, t_hw))

    out_dtype = x_nchw.dtype
    cost = pl.CostEstimate(
        flops=2 * N * HW * C * O,
        transcendentals=0,
        bytes_accessed=(x_mat.size * x_mat.dtype.itemsize
                        + weight.size * weight.dtype.itemsize
                        + bias.size * bias.dtype.itemsize
                        + N * O * HW * jnp.dtype(out_dtype).itemsize),
    )

    out = pl.pallas_call(
        _conv1x1_kernel,
        out_shape=jax.ShapeDtypeStruct((N, O, HW), out_dtype),
        grid_spec=pltpu.PrefetchScalarGridSpec(
            num_scalar_prefetch=0,
            grid=grid,
            in_specs=[
                pl.BlockSpec((None, C, t_hw), lambda n, j: (n, 0, j)),  # X tile
                pl.BlockSpec((O, C), lambda n, j: (0, 0)),              # weights
                pl.BlockSpec((O, 1), lambda n, j: (0, 0)),              # bias col
            ],
            out_specs=pl.BlockSpec((None, O, t_hw), lambda n, j: (n, 0, j)),
        ),
        compiler_params=pltpu.CompilerParams(
            dimension_semantics=("parallel", "parallel"),
        ),
        cost_estimate=cost,
    )(x_mat, weight, b_col)

    return out.reshape(N, O, H, W)       # free contiguous reshape


if __name__ == "__main__":
    # Module defaults: inchannels=512, num_anchors=3 -> out channels = 6.
    N, C, H, W = 2, 512, 16, 16
    num_anchors = 3
    O = num_anchors * 2

    key = jax.random.PRNGKey(0)
    kx, kw, kb = jax.random.split(key, 3)

    x = jax.random.normal(kx, (N, C, H, W), dtype=jnp.float32)
    # Deterministic parameter init (uniform, roughly PyTorch's default scale).
    bound = 1.0 / jnp.sqrt(jnp.float32(C))
    weight = jax.random.uniform(kw, (O, C), jnp.float32, -bound, bound)
    bias = jax.random.uniform(kb, (O,), jnp.float32, -bound, bound)

    out = class_head_forward(x, weight, bias)
    out = jax.block_until_ready(out)

    # Reference check (pure JAX 1x1 conv == per-pixel matmul).
    ref = jnp.einsum("nchw,oc->nohw", x, weight) + bias[None, :, None, None]
    assert out.shape == (N, O, H, W)
    assert jnp.allclose(out, ref, atol=2e-4, rtol=2e-4)

    print("KERNEL_OK")
</pallas_src>

<mosaic_0001>
module attributes {stable_mosaic.version = 11 : i64} {
  func.func @_conv1x1_kernel(%arg0: i32, %arg1: i32, %arg2: memref<1x512x128xf32, #tpu.memory_space<vmem>>, %arg3: memref<6x512xf32, #tpu.memory_space<vmem>>, %arg4: memref<6x1xf32, #tpu.memory_space<vmem>>, %arg5: memref<1x6x128xf32, #tpu.memory_space<vmem>>) attributes {dimension_semantics = [#tpu.dimension_semantics<parallel>, #tpu.dimension_semantics<parallel>], iteration_bounds = array<i64: 2, 2>, scalar_prefetch = 0 : i64, scratch_operands = 0 : i64, tpu.core_type = #tpu.core_type<tc>, window_params = [{transform_indices = @transform_0, window_bounds = array<i64: 1, 512, 128>}, {pipeline_mode = #tpu.pipeline_mode<synchronous>, transform_indices = @transform_1, window_bounds = array<i64: 6, 512>}, {pipeline_mode = #tpu.pipeline_mode<synchronous>, transform_indices = @transform_2, window_bounds = array<i64: 6, 1>}, {transform_indices = @transform_3, window_bounds = array<i64: 1, 6, 128>}]} {
    %c0 = arith.constant 0 : index
    %c0_0 = arith.constant 0 : index
    %0 = vector.load %arg3[%c0, %c0_0] : memref<6x512xf32, #tpu.memory_space<vmem>>, vector<6x512xf32>
    %c0_1 = arith.constant 0 : index
    %c0_2 = arith.constant 0 : index
    %c0_3 = arith.constant 0 : index
    %1 = vector.load %arg2[%c0_1, %c0_2, %c0_3] : memref<1x512x128xf32, #tpu.memory_space<vmem>>, vector<1x512x128xf32>
    %2 = vector.shape_cast %1 : vector<1x512x128xf32> to vector<512x128xf32>
    %cst = arith.constant dense<0.000000e+00> : vector<6x128xf32>
    %3 = tpu.matmul %0, %2, %cst {dimension_numbers = #tpu.dot_dimension_numbers<[1], [0], [0], [1], [0, 0, 1, 1], [], []>} : vector<6x512xf32>, vector<512x128xf32>, vector<6x128xf32> -> vector<6x128xf32>
    %c0_4 = arith.constant 0 : index
    %c0_5 = arith.constant 0 : index
    %4 = vector.load %arg4[%c0_4, %c0_5] : memref<6x1xf32, #tpu.memory_space<vmem>>, vector<6x1xf32>
    %5 = vector.broadcast %4 : vector<6x1xf32> to vector<6x128xf32>
    %6 = arith.addf %3, %5 : vector<6x128xf32>
    %c0_6 = arith.constant 0 : index
    %c0_7 = arith.constant 0 : index
    %c0_8 = arith.constant 0 : index
    %7 = vector.load %arg5[%c0_6, %c0_7, %c0_8] : memref<1x6x128xf32, #tpu.memory_space<vmem>>, vector<1x6x128xf32>
    %8 = vector.shape_cast %7 : vector<1x6x128xf32> to vector<6x128xf32>
    %9 = vector.shape_cast %6 : vector<6x128xf32> to vector<1x6x128xf32>
    tpu.vector_store %arg5[%c0_6, %c0_7, %c0_8], %9 {strides = array<i32>} : memref<1x6x128xf32, #tpu.memory_space<vmem>>, vector<1x6x128xf32>,
    return
  }
  func.func @transform_0(%arg0: i32, %arg1: i32) -> (i32, i32, i32) {
    %c0_i32 = arith.constant 0 : i32
    %c0_i32_0 = arith.constant 0 : i32
    return %arg0, %c0_i32, %arg1 : i32, i32, i32
  }
  func.func @transform_1(%arg0: i32, %arg1: i32) -> (i32, i32) {
    %c0_i32 = arith.constant 0 : i32
    %c0_i32_0 = arith.constant 0 : i32
    %c0_i32_1 = arith.constant 0 : i32
    return %c0_i32, %c0_i32_0 : i32, i32
  }
  func.func @transform_2(%arg0: i32, %arg1: i32) -> (i32, i32) {
    %c0_i32 = arith.constant 0 : i32
    %c0_i32_0 = arith.constant 0 : i32
    %c0_i32_1 = arith.constant 0 : i32
    return %c0_i32, %c0_i32_0 : i32, i32
  }
  func.func @transform_3(%arg0: i32, %arg1: i32) -> (i32, i32, i32) {
    %c0_i32 = arith.constant 0 : i32
    %c0_i32_0 = arith.constant 0 : i32
    return %arg0, %c0_i32, %arg1 : i32, i32, i32
  }
}

</mosaic_0001>

<bundles_post_ra>
// kernel: class_head_forward.1
= control target key start
LH: loop header
LB: loop body
LE: loop exit
PB: predicated region body
PF: predicated region fallthrough
CT: control target
= control target key end

     0   :  { %s1066_s12 = smov 0   ;;  %s1068_s13 = smov 0   ;;  %s1370_s0 = inlined_call_operand.vmem [shape: f32[2,512,256], index: 0, kind: input, shape index: {}]   ;;  %s1371_s1 = inlined_call_operand.vmem [shape: f32[6,512], index: 1, kind: input, shape index: {}]   ;;  %s1372_s2 = inlined_call_operand.vmem [shape: f32[6,1], index: 2, kind: input, shape index: {}]   ;;  %s1373_s3 = inlined_call_operand.vmem [shape: f32[2,6,256], index: 3, kind: output, shape index: {}]  }
   0x1   :  { %s1070_s14 = smov 0   ;;  %s1072_s15 = smov 0  }
   0x2   :  { %s1074_s16 = smov 0   ;;  %s1076_s17 = smov 0  }
   0x3   :  { %s1078_s18 = smov 0  }
   0x4 LB: > { %s22_s19 = sadd.s32 1, %s1035_s16  ;;  %s25_s20 = sadd.s32 1, %s1039_s17  ;;  %s1043_s18 = sphi %s1078_s18, %s13_s18   ;;  %s1039_s17 = sphi %s1076_s17, %s1379_s17   ;;  %s1035_s16 = sphi %s1074_s16, %s1378_s16   ;;  %s1031_s15 = sphi %s1072_s15, %s1377_s15   ;;  %s1027_s14 = sphi %s1070_s14, %s1376_s14   ;;  %s1023_s13 = sphi %s1068_s13, %s1375_s13   ;;  %s1019_s12 = sphi %s1066_s12, %s1374_s12  }
   0x5   : > { %p23_p0 = scmp.ge.s32.totalorder %s22_s19, 2  ;;  %p41_p1 = scmp.ne.s32.totalorder %s1023_s13, %s1019_s12 }
   0x6   : > { %p42_p2 = scmp.eq.s32.totalorder %s1043_s18, 0  ;;  %s34_s24 = sadd.s32 1, %s1023_s13 }
   0x7   : > { %s1381_s19 = smov (%p23_p0, %s22_s19), 0  ;;  %s1383_s20 = smov (!%p23_p0, %s25_s20), %s1039_s17 }
   0x8   : > { %p43_p3 = por %p42_p2, %p41_p1  ;;  %p27_p4 = scmp.ge.s32.totalorder %s1383_s20, 2 }
   0x9   : > { %s30_s21 = ssub.s32 %s1035_s16, %s1381_s19  ;;  %p787_p6 = scmp.ge.s32.totalorder %s1043_s18, 4 }
   0xa   : > { %s1385_s20 = smov (%p27_p4, %s1383_s20), 0 }
   0xb   : > { %s29_s22 = ssub.s32 %s1039_s17, %s1385_s20  ;;  %143 = sbr.rel (%p787_p6) target bundleno = 56 (0x38), region = 24 }
   0xc   : > { %s31_s23 = sor.u32 %s30_s21, %s29_s22 }
   0xd   : > { %p32_p5 = scmp.eq.s32.totalorder %s31_s23, 0 }
   0xf   : > { %s1117_s25 = scalar_select %p32_p5, %s1023_s13, %s34_s24  }
  0x12   : > { %146 = sbr.rel (!%p43_p3) target bundleno = 56 (0x38), region = 28  ;;  %s148_s26 = sand.u32 (%p43_p3), 1, %s1023_s13  }
  0x13   : > { %s789_s27 = sshll.u32 (%p43_p3), %s1039_s17, 7  ;;  %s788_s28 = sshll.u32 (%p43_p3), %s148_s26, 9 }
  0x14   : > { %s152_s29 = sadd.s32 (%p43_p3), %s1035_s16, %s789_s27  ;;  %s1131_s7 = scalar_lea.vmem (%p43_p3), [#allocation2], %s788_s28 }
  0x15   : > { %s790_s30 = sshll.u32 (%p43_p3), %s152_s29, 3 }
  0x16   : > { %s1126_s6 = scalar_lea.vmem (%p43_p3), %s1370_s0, %s790_s30 }
  0x17   : > { %v308_v0 = vld [vmem:[%s1126_s6] sm:$0xff] (%p43_p3)  ;;  %v310_v1 = vld [vmem:[%s1126_s6 + $0x10] sm:$0xff] (%p43_p3) }
  0x18   : > { %v312_v2 = vld [vmem:[%s1126_s6 + $0x20] sm:$0xff] (%p43_p3)  ;;  %309 = vst [vmem:[%s1131_s7] sm:$0xff] (%p43_p3), %v308_v0  ;;  %311 = vst [vmem:[%s1131_s7 + $0x8] sm:$0xff] (%p43_p3), %v310_v1  ;;  %v314_v3 = vld [vmem:[%s1126_s6 + $0x30] sm:$0xff] (%p43_p3) }
  0x19   : > { %313 = vst [vmem:[%s1131_s7 + $0x10] sm:$0xff] %v312_v2  ;;  %v316_v4 = vld [vmem:[%s1126_s6 + $0x40] sm:$0xff]  ;;  %v318_v5 = vld [vmem:[%s1126_s6 + $0x50] sm:$0xff]  ;;  %315 = vst [vmem:[%s1131_s7 + $0x18] sm:$0xff] %v314_v3 }
  0x1a   : > { %317 = vst [vmem:[%s1131_s7 + $0x20] sm:$0xff] %v316_v4  ;;  %319 = vst [vmem:[%s1131_s7 + $0x28] sm:$0xff] %v318_v5  ;;  %v320_v6 = vld [vmem:[%s1126_s6 + $0x60] sm:$0xff]  ;;  %v322_v7 = vld [vmem:[%s1126_s6 + $0x70] sm:$0xff] }
  0x1b   : > { %v324_v8 = vld [vmem:[%s1126_s6 + $0x80] sm:$0xff]  ;;  %321 = vst [vmem:[%s1131_s7 + $0x30] sm:$0xff] %v320_v6  ;;  %323 = vst [vmem:[%s1131_s7 + $0x38] sm:$0xff] %v322_v7  ;;  %v326_v9 = vld [vmem:[%s1126_s6 + $0x90] sm:$0xff] }
  0x1c   : > { %325 = vst [vmem:[%s1131_s7 + $0x40] sm:$0xff] %v324_v8  ;;  %v328_v10 = vld [vmem:[%s1126_s6 + $0xa0] sm:$0xff]  ;;  %v330_v11 = vld [vmem:[%s1126_s6 + $0xb0] sm:$0xff]  ;;  %327 = vst [vmem:[%s1131_s7 + $0x48] sm:$0xff] %v326_v9 }
  0x1d   : > { %329 = vst [vmem:[%s1131_s7 + $0x50] sm:$0xff] %v328_v10  ;;  %331 = vst [vmem:[%s1131_s7 + $0x58] sm:$0xff] %v330_v11  ;;  %v332_v12 = vld [vmem:[%s1126_s6 + $0xc0] sm:$0xff]  ;;  %v334_v13 = vld [vmem:[%s1126_s6 + $0xd0] sm:$0xff] }
  0x1e   : > { %v336_v14 = vld [vmem:[%s1126_s6 + $0xe0] sm:$0xff]  ;;  %333 = vst [vmem:[%s1131_s7 + $0x60] sm:$0xff] %v332_v12  ;;  %335 = vst [vmem:[%s1131_s7 + $0x68] sm:$0xff] %v334_v13  ;;  %v338_v15 = vld [vmem:[%s1126_s6 + $0xf0] sm:$0xff] }
  0x1f   : > { %337 = vst [vmem:[%s1131_s7 + $0x70] sm:$0xff] %v336_v14  ;;  %v340_v16 = vld [vmem:[%s1126_s6 + $0x100] sm:$0xff]  ;;  %v342_v17 = vld [vmem:[%s1126_s6 + $0x110] sm:$0xff]  ;;  %339 = vst [vmem:[%s1131_s7 + $0x78] sm:$0xff] %v338_v15 }
  0x20   : > { %341 = vst [vmem:[%s1131_s7 + $0x80] sm:$0xff] %v340_v16  ;;  %343 = vst [vmem:[%s1131_s7 + $0x88] sm:$0xff] %v342_v17  ;;  %v344_v18 = vld [vmem:[%s1126_s6 + $0x120] sm:$0xff]  ;;  %v346_v19 = vld [vmem:[%s1126_s6 + $0x130] sm:$0xff] }
  0x21   : > { %v348_v20 = vld [vmem:[%s1126_s6 + $0x140] sm:$0xff]  ;;  %345 = vst [vmem:[%s1131_s7 + $0x90] sm:$0xff] %v344_v18  ;;  %347 = vst [vmem:[%s1131_s7 + $0x98] sm:$0xff] %v346_v19  ;;  %v350_v21 = vld [vmem:[%s1126_s6 + $0x150] sm:$0xff] }
  0x22   : > { %349 = vst [vmem:[%s1131_s7 + $0xa0] sm:$0xff] %v348_v20  ;;  %v352_v22 = vld [vmem:[%s1126_s6 + $0x160] sm:$0xff]  ;;  %v354_v23 = vld [vmem:[%s1126_s6 + $0x170] sm:$0xff]  ;;  %351 = vst [vmem:[%s1131_s7 + $0xa8] sm:$0xff] %v350_v21 }
  0x23   : > { %353 = vst [vmem:[%s1131_s7 + $0xb0] sm:$0xff] %v352_v22  ;;  %355 = vst [vmem:[%s1131_s7 + $0xb8] sm:$0xff] %v354_v23  ;;  %v356_v24 = vld [vmem:[%s1126_s6 + $0x180] sm:$0xff]  ;;  %v358_v25 = vld [vmem:[%s1126_s6 + $0x190] sm:$0xff] }
  0x24   : > { %v360_v26 = vld [vmem:[%s1126_s6 + $0x1a0] sm:$0xff]  ;;  %357 = vst [vmem:[%s1131_s7 + $0xc0] sm:$0xff] %v356_v24  ;;  %359 = vst [vmem:[%s1131_s7 + $0xc8] sm:$0xff] %v358_v25  ;;  %v362_v27 = vld [vmem:[%s1126_s6 + $0x1b0] sm:$0xff] }
  0x25   : > { %361 = vst [vmem:[%s1131_s7 + $0xd0] sm:$0xff] %v360_v26  ;;  %v364_v28 = vld [vmem:[%s1126_s6 + $0x1c0] sm:$0xff]  ;;  %v366_v29 = vld [vmem:[%s1126_s6 + $0x1d0] sm:$0xff]  ;;  %363 = vst [vmem:[%s1131_s7 + $0xd8] sm:$0xff] %v362_v27 }
  0x26   : > { %365 = vst [vmem:[%s1131_s7 + $0xe0] sm:$0xff] %v364_v28  ;;  %367 = vst [vmem:[%s1131_s7 + $0xe8] sm:$0xff] %v366_v29  ;;  %v368_v30 = vld [vmem:[%s1126_s6 + $0x1e0] sm:$0xff]  ;;  %v370_v31 = vld [vmem:[%s1126_s6 + $0x1f0] sm:$0xff] }
  0x27   : > { %v372_v32 = vld [vmem:[%s1126_s6 + $0x200] sm:$0xff]  ;;  %369 = vst [vmem:[%s1131_s7 + $0xf0] sm:$0xff] %v368_v30  ;;  %371 = vst [vmem:[%s1131_s7 + $0xf8] sm:$0xff] %v370_v31  ;;  %v374_v33 = vld [vmem:[%s1126_s6 + $0x210] sm:$0xff] }
  0x28   : > { %373 = vst [vmem:[%s1131_s7 + $0x100] sm:$0xff] %v372_v32  ;;  %v376_v34 = vld [vmem:[%s1126_s6 + $0x220] sm:$0xff]  ;;  %v378_v35 = vld [vmem:[%s1126_s6 + $0x230] sm:$0xff]  ;;  %375 = vst [vmem:[%s1131_s7 + $0x108] sm:$0xff] %v374_v33 }
  0x29   : > { %377 = vst [vmem:[%s1131_s7 + $0x110] sm:$0xff] %v376_v34  ;;  %379 = vst [vmem:[%s1131_s7 + $0x118] sm:$0xff] %v378_v35  ;;  %v380_v36 = vld [vmem:[%s1126_s6 + $0x240] sm:$0xff]  ;;  %v382_v37 = vld [vmem:[%s1126_s6 + $0x250] sm:$0xff] }
  0x2a   : > { %v384_v38 = vld [vmem:[%s1126_s6 + $0x260] sm:$0xff]  ;;  %381 = vst [vmem:[%s1131_s7 + $0x120] sm:$0xff] %v380_v36  ;;  %383 = vst [vmem:[%s1131_s7 + $0x128] sm:$0xff] %v382_v37  ;;  %v386_v39 = vld [vmem:[%s1126_s6 + $0x270] sm:$0xff] }
  0x2b   : > { %385 = vst [vmem:[%s1131_s7 + $0x130] sm:$0xff] %v384_v38  ;;  %v388_v40 = vld [vmem:[%s1126_s6 + $0x280] sm:$0xff]  ;;  %v390_v41 = vld [vmem:[%s1126_s6 + $0x290] sm:$0xff]  ;;  %387 = vst [vmem:[%s1131_s7 + $0x138] sm:$0xff] %v386_v39 }
  0x2c   : > { %389 = vst [vmem:[%s1131_s7 + $0x140] sm:$0xff] %v388_v40  ;;  %391 = vst [vmem:[%s1131_s7 + $0x148] sm:$0xff] %v390_v41  ;;  %v392_v42 = vld [vmem:[%s1126_s6 + $0x2a0] sm:$0xff]  ;;  %v394_v43 = vld [vmem:[%s1126_s6 + $0x2b0] sm:$0xff] }
  0x2d   : > { %v396_v44 = vld [vmem:[%s1126_s6 + $0x2c0] sm:$0xff]  ;;  %393 = vst [vmem:[%s1131_s7 + $0x150] sm:$0xff] %v392_v42  ;;  %395 = vst [vmem:[%s1131_s7 + $0x158] sm:$0xff] %v394_v43  ;;  %v398_v45 = vld [vmem:[%s1126_s6 + $0x2d0] sm:$0xff] }
  0x2e   : > { %397 = vst [vmem:[%s1131_s7 + $0x160] sm:$0xff] %v396_v44  ;;  %v400_v46 = vld [vmem:[%s1126_s6 + $0x2e0] sm:$0xff]  ;;  %v402_v47 = vld [vmem:[%s1126_s6 + $0x2f0] sm:$0xff]  ;;  %399 = vst [vmem:[%s1131_s7 + $0x168] sm:$0xff] %v398_v45 }
  0x2f   : > { %401 = vst [vmem:[%s1131_s7 + $0x170] sm:$0xff] %v400_v46  ;;  %403 = vst [vmem:[%s1131_s7 + $0x178] sm:$0xff] %v402_v47  ;;  %v404_v48 = vld [vmem:[%s1126_s6 + $0x300] sm:$0xff]  ;;  %v406_v49 = vld [vmem:[%s1126_s6 + $0x310] sm:$0xff] }
  0x30   : > { %v408_v50 = vld [vmem:[%s1126_s6 + $0x320] sm:$0xff]  ;;  %405 = vst [vmem:[%s1131_s7 + $0x180] sm:$0xff] %v404_v48  ;;  %407 = vst [vmem:[%s1131_s7 + $0x188] sm:$0xff] %v406_v49  ;;  %v410_v51 = vld [vmem:[%s1126_s6 + $0x330] sm:$0xff] }
  0x31   : > { %409 = vst [vmem:[%s1131_s7 + $0x190] sm:$0xff] %v408_v50  ;;  %v412_v52 = vld [vmem:[%s1126_s6 + $0x340] sm:$0xff]  ;;  %v414_v53 = vld [vmem:[%s1126_s6 + $0x350] sm:$0xff]  ;;  %411 = vst [vmem:[%s1131_s7 + $0x198] sm:$0xff] %v410_v51 }
  0x32   : > { %413 = vst [vmem:[%s1131_s7 + $0x1a0] sm:$0xff] %v412_v52  ;;  %415 = vst [vmem:[%s1131_s7 + $0x1a8] sm:$0xff] %v414_v53  ;;  %v416_v54 = vld [vmem:[%s1126_s6 + $0x360] sm:$0xff]  ;;  %v418_v55 = vld [vmem:[%s1126_s6 + $0x370] sm:$0xff] }
  0x33   : > { %v420_v56 = vld [vmem:[%s1126_s6 + $0x380] sm:$0xff]  ;;  %417 = vst [vmem:[%s1131_s7 + $0x1b0] sm:$0xff] %v416_v54  ;;  %419 = vst [vmem:[%s1131_s7 + $0x1b8] sm:$0xff] %v418_v55  ;;  %v422_v57 = vld [vmem:[%s1126_s6 + $0x390] sm:$0xff] }
  0x34   : > { %421 = vst [vmem:[%s1131_s7 + $0x1c0] sm:$0xff] %v420_v56  ;;  %v424_v58 = vld [vmem:[%s1126_s6 + $0x3a0] sm:$0xff]  ;;  %v426_v59 = vld [vmem:[%s1126_s6 + $0x3b0] sm:$0xff]  ;;  %423 = vst [vmem:[%s1131_s7 + $0x1c8] sm:$0xff] %v422_v57 }
  0x35   : > { %425 = vst [vmem:[%s1131_s7 + $0x1d0] sm:$0xff] %v424_v58  ;;  %427 = vst [vmem:[%s1131_s7 + $0x1d8] sm:$0xff] %v426_v59  ;;  %v428_v60 = vld [vmem:[%s1126_s6 + $0x3c0] sm:$0xff]  ;;  %v430_v61 = vld [vmem:[%s1126_s6 + $0x3d0] sm:$0xff] }
  0x36   : > { %v432_v62 = vld [vmem:[%s1126_s6 + $0x3e0] sm:$0xff]  ;;  %429 = vst [vmem:[%s1131_s7 + $0x1e0] sm:$0xff] %v428_v60  ;;  %431 = vst [vmem:[%s1131_s7 + $0x1e8] sm:$0xff] %v430_v61  ;;  %v434_v63 = vld [vmem:[%s1126_s6 + $0x3f0] sm:$0xff] }
  0x37   : > { %433 = vst [vmem:[%s1131_s7 + $0x1f0] sm:$0xff] %v432_v62  ;;  %435 = vst [vmem:[%s1131_s7 + $0x1f8] sm:$0xff] %v434_v63 }
  0x38 PF: > { %p791_p7 = scmp.ge.s32.totalorder %s1043_s18, 1  ;;  %p440_p8 = scmp.lt.s32.totalorder %s1043_s18, 5 }
  0x3a   : > { %p441_p9 = pnand %p791_p7, %p440_p8 }
  0x3b   : > { %s447_s8 = sand.u32 (!%p441_p9), 1, %s1019_s12   ;;  %v482_v0 = vld [vmem:[%s1371_s1 + $0x8] sm:$0x3f] (!%p441_p9)  ;;  %v484_v1 = vld [vmem:[%s1371_s1 + $0x18] sm:$0x3f] (!%p441_p9)  ;;  %v1045_v2 = vmov (!%p441_p9), 0  }
  0x3c   : > { %444 = sbr.rel (%p441_p9) target bundleno = 317 (0x13d), region = 66  ;;  %s792_s11 = sshll.u32 (!%p441_p9), %s447_s8, 9  ;;  %619 = vmatprep.mubr.f32.mxu0 (!%p441_p9), %v482_v0  ;;  %988 = vset.pattern.permute.xlu0 (!%p441_p9), %v1045_v2  ;;  %v549_v3 = vld [vmem:[%s1372_s2] sm:$0x3f] (!%p441_p9) }
  0x3d   : > { %689 = vmatprep.mubr.f32.mxu1 (!%p441_p9), %v484_v1  ;;  %s1270_s26 = scalar_lea.vmem (!%p441_p9), [#allocation2], %s792_s11  ;;  %552 = vperm.xlu0 (!%p441_p9), %988, %v549_v3   ;;  %p473_p10 = scmp.lt.s32.totalorder (!%p441_p9), %s1031_s15, 1 }
  0x3e   : > { %v501_v4 = vld [vmem:[%s1270_s26 + $0x80] sm:$0xff] (!%p441_p9)  ;;  %v502_v5 = vld [vmem:[%s1270_s26 + $0x88] sm:$0xff] (!%p441_p9)  ;;  %v503_v15 = vld [vmem:[%s1270_s26 + $0x90] sm:$0xff] (!%p441_p9)  ;;  %p475_p11 = scmp.lt.s32.totalorder (!%p441_p9), %s1027_s14, 1 }
  0x3f   : > { %v485_v6 = vld [vmem:[%s1270_s26] sm:$0xff] (!%p441_p9)  ;;  %v867_v7 = vpack.c.bf16 (!%p441_p9), %v502_v5, %v501_v4  ;;  %v486_v8 = vld [vmem:[%s1270_s26 + $0x8] sm:$0xff] (!%p441_p9)  ;;  %v504_v17 = vld [vmem:[%s1270_s26 + $0x98] sm:$0xff] (!%p441_p9) }
  0x40   : > { %v533_v9 = vld [vmem:[%s1270_s26 + $0x180] sm:$0xff] (!%p441_p9)  ;;  %v534_v10 = vld [vmem:[%s1270_s26 + $0x188] sm:$0xff] (!%p441_p9)  ;;  %v869_v11 = vpack.c.bf16 (!%p441_p9), %v486_v8, %v485_v6  ;;  %v487_v18 = vld [vmem:[%s1270_s26 + $0x10] sm:$0xff] (!%p441_p9)  ;;  %v871_v20 = vpack.c.bf16 (!%p441_p9), %v504_v17, %v503_v15 }
  0x41   : > { %v899_v12 = vpack.c.bf16 (!%p441_p9), %v534_v10, %v533_v9  ;;  %v517_v13 = vld [vmem:[%s1270_s26 + $0x100] sm:$0xff] (!%p441_p9)  ;;  %v518_v14 = vld [vmem:[%s1270_s26 + $0x108] sm:$0xff] (!%p441_p9)  ;;  %868 = vmatprep.subr.bf16.mxu0 (!%p441_p9), %v867_v7  ;;  %v488_v19 = vld [vmem:[%s1270_s26 + $0x18] sm:$0xff] (!%p441_p9) }
  0x42   : > { %v901_v16 = vpack.c.bf16 (!%p441_p9), %v518_v14, %v517_v13  ;;  %870 = vmatpush3.bf16.msra.mxu0 (!%p441_p9), %v869_v11  ;;  %v873_v21 = vpack.c.bf16 (!%p441_p9), %v488_v19, %v487_v18  ;;  %v535_v22 = vld [vmem:[%s1270_s26 + $0x190] sm:$0xff] (!%p441_p9)  ;;  %v536_v23 = vld [vmem:[%s1270_s26 + $0x198] sm:$0xff] (!%p441_p9)  ;;  %v505_v27 = vld [vmem:[%s1270_s26 + $0xa0] sm:$0xff] (!%p441_p9) }
  0x43   : > { %900 = vmatprep.subr.bf16.mxu1 %v899_v12  ;;  %v519_v24 = vld [vmem:[%s1270_s26 + $0x110] sm:$0xff]  ;;  %v903_v25 = vpack.c.bf16 %v536_v23, %v535_v22  ;;  %v520_v26 = vld [vmem:[%s1270_s26 + $0x118] sm:$0xff]  ;;  %v506_v28 = vld [vmem:[%s1270_s26 + $0xa8] sm:$0xff]  ;;  %872 = vmatprep.subr.bf16.mxu0 %v871_v20  ;;  %s1387_s15 = smov (!%p473_p10, %s1031_s15), 1  ;;  %s1389_s14 = smov (!%p475_p11, %s1027_s14), 1 }
  0x44   : > { %902 = vmatpush3.bf16.msra.mxu1 %v901_v16  ;;  %v905_v29 = vpack.c.bf16 %v520_v26, %v519_v24  ;;  %v875_v30 = vpack.c.bf16 %v506_v28, %v505_v27  ;;  %v489_v31 = vld [vmem:[%s1270_s26 + $0x20] sm:$0xff]  ;;  %v490_v32 = vld [vmem:[%s1270_s26 + $0x28] sm:$0xff]  ;;  %v507_v39 = vld [vmem:[%s1270_s26 + $0xb0] sm:$0xff]  ;;  %s793_s30 = sshll.u32 %s1387_s15, 1 }
  0x45   : > { %v537_v33 = vld [vmem:[%s1270_s26 + $0x1a0] sm:$0xff]  ;;  %904 = vmatprep.subr.bf16.mxu1 %v903_v25  ;;  %v538_v34 = vld [vmem:[%s1270_s26 + $0x1a8] sm:$0xff]  ;;  %v877_v37 = vpack.c.bf16 %v490_v32, %v489_v31  ;;  %v508_v40 = vld [vmem:[%s1270_s26 + $0xb8] sm:$0xff]  ;;  %s478_s4 = sadd.s32 %s793_s30, %s1389_s14 }
  0x46   : > { %v521_v35 = vld [vmem:[%s1270_s26 + $0x120] sm:$0xff]  ;;  %v522_v36 = vld [vmem:[%s1270_s26 + $0x128] sm:$0xff]  ;;  %874 = vmatpush3.bf16.msra.mxu0 %v873_v21  ;;  %v907_v38 = vpack.c.bf16 %v538_v34, %v537_v33  ;;  %v491_v41 = vld [vmem:[%s1270_s26 + $0x30] sm:$0xff]  ;;  %v879_v43 = vpack.c.bf16 %v508_v40, %v507_v39  ;;  %s794_s5 = sshll.u32 %s478_s4, 3 }
  0x47   : > { %876 = vmatprep.subr.bf16.mxu0 %v875_v30  ;;  %v909_v42 = vpack.c.bf16 %v522_v36, %v521_v35  ;;  %v492_v44 = vld [vmem:[%s1270_s26 + $0x38] sm:$0xff]  ;;  %v539_v45 = vld [vmem:[%s1270_s26 + $0x1b0] sm:$0xff]  ;;  %v509_v50 = vld [vmem:[%s1270_s26 + $0xc0] sm:$0xff]  ;;  %s480_s8 = scalar_lea.vmem %s1373_s3, %s794_s5 }
  0x48   : > { %906 = vmatpush3.bf16.msra.mxu1 %v905_v29  ;;  %v540_v46 = vld [vmem:[%s1270_s26 + $0x1b8] sm:$0xff]  ;;  %v523_v48 = vld [vmem:[%s1270_s26 + $0x130] sm:$0xff]  ;;  %v510_v51 = vld [vmem:[%s1270_s26 + $0xc8] sm:$0xff]  ;;  %v881_v52 = vpack.c.bf16 %v492_v44, %v491_v41 }
  0x49   : > { %908 = vmatprep.subr.bf16.mxu1 %v907_v38  ;;  %v911_v47 = vpack.c.bf16 %v540_v46, %v539_v45  ;;  %v524_v49 = vld [vmem:[%s1270_s26 + $0x138] sm:$0xff]  ;;  %v541_v53 = vld [vmem:[%s1270_s26 + $0x1c0] sm:$0xff]  ;;  %v542_v54 = vld [vmem:[%s1270_s26 + $0x1c8] sm:$0xff]  ;;  %v883_v56 = vpack.c.bf16 %v510_v51, %v509_v50 }
  0x4a   : > { %878 = vmatpush3.bf16.msra.mxu0 %v877_v37  ;;  %v913_v55 = vpack.c.bf16 %v524_v49, %v523_v48  ;;  %v493_v57 = vld [vmem:[%s1270_s26 + $0x40] sm:$0xff]  ;;  %v494_v58 = vld [vmem:[%s1270_s26 + $0x48] sm:$0xff]  ;;  %v915_v60 = vpack.c.bf16 %v542_v54, %v541_v53  ;;  %v511_v62 = vld [vmem:[%s1270_s26 + $0xd0] sm:$0xff] }
  0x4b   : > { %880 = vmatprep.subr.bf16.mxu0 %v879_v43  ;;  %v525_v59 = vld [vmem:[%s1270_s26 + $0x140] sm:$0xff]  ;;  %v526_v61 = vld [vmem:[%s1270_s26 + $0x148] sm:$0xff]  ;;  %v512_v63 = vld [vmem:[%s1270_s26 + $0xd8] sm:$0xff]  ;;  %v885_v2 = vpack.c.bf16 %v494_v58, %v493_v57 }
  0x4c   : > { %910 = vmatpush3.bf16.msra.mxu1 %v909_v42  ;;  %v543_v0 = vld [vmem:[%s1270_s26 + $0x1d0] sm:$0xff]  ;;  %v544_v1 = vld [vmem:[%s1270_s26 + $0x1d8] sm:$0xff]  ;;  %v917_v3 = vpack.c.bf16 %v526_v61, %v525_v59  ;;  %v887_v4 = vpack.c.bf16 %v512_v63, %v511_v62  ;;  %v513_v10 = vld [vmem:[%s1270_s26 + $0xe0] sm:$0xff] }
  0x4d   : > { %912 = vmatprep.subr.bf16.mxu1 %v911_v47  ;;  %v495_v5 = vld [vmem:[%s1270_s26 + $0x50] sm:$0xff]  ;;  %v496_v6 = vld [vmem:[%s1270_s26 + $0x58] sm:$0xff]  ;;  %v919_v8 = vpack.c.bf16 %v544_v1, %v543_v0  ;;  %v514_v11 = vld [vmem:[%s1270_s26 + $0xe8] sm:$0xff] }
  0x4e   : > { %882 = vmatpush3.bf16.msra.mxu0 %v881_v52  ;;  %v527_v7 = vld [vmem:[%s1270_s26 + $0x150] sm:$0xff]  ;;  %v528_v9 = vld [vmem:[%s1270_s26 + $0x158] sm:$0xff]  ;;  %v545_v12 = vld [vmem:[%s1270_s26 + $0x1e0] sm:$0xff]  ;;  %v889_v14 = vpack.c.bf16 %v496_v6, %v495_v5  ;;  %v891_v16 = vpack.c.bf16 %v514_v11, %v513_v10 }
  0x4f   : > { %884 = vmatprep.subr.bf16.mxu0 %v883_v56  ;;  %v546_v13 = vld [vmem:[%s1270_s26 + $0x1e8] sm:$0xff]  ;;  %v921_v15 = vpack.c.bf16 %v528_v9, %v527_v7  ;;  %v497_v17 = vld [vmem:[%s1270_s26 + $0x60] sm:$0xff]  ;;  %v515_v22 = vld [vmem:[%s1270_s26 + $0xf0] sm:$0xff] }
  0x50   : > { %914 = vmatpush3.bf16.msra.mxu1 %v913_v55  ;;  %v498_v18 = vld [vmem:[%s1270_s26 + $0x68] sm:$0xff]  ;;  %v529_v19 = vld [vmem:[%s1270_s26 + $0x160] sm:$0xff]  ;;  %v923_v20 = vpack.c.bf16 %v546_v13, %v545_v12  ;;  %v516_v23 = vld [vmem:[%s1270_s26 + $0xf8] sm:$0xff] }
  0x51   : > { %916 = vmatprep.subr.bf16.mxu1 %v915_v60  ;;  %v530_v21 = vld [vmem:[%s1270_s26 + $0x168] sm:$0xff]  ;;  %v547_v24 = vld [vmem:[%s1270_s26 + $0x1f0] sm:$0xff]  ;;  %v548_v25 = vld [vmem:[%s1270_s26 + $0x1f8] sm:$0xff]  ;;  %v893_v26 = vpack.c.bf16 %v498_v18, %v497_v17  ;;  %v895_v28 = vpack.c.bf16 %v516_v23, %v515_v22 }
  0x52   : > { %886 = vmatpush3.bf16.msra.mxu0 %v885_v2  ;;  %v925_v27 = vpack.c.bf16 %v530_v21, %v529_v19  ;;  %v499_v29 = vld [vmem:[%s1270_s26 + $0x70] sm:$0xff]  ;;  %v500_v30 = vld [vmem:[%s1270_s26 + $0x78] sm:$0xff]  ;;  %v927_v31 = vpack.c.bf16 %v548_v25, %v547_v24  ;;  %v481_v36 = vld [vmem:[%s1371_s1] sm:$0x3f] }
  0x53   : > { %888 = vmatprep.subr.bf16.mxu0 %v887_v4  ;;  %v531_v32 = vld [vmem:[%s1270_s26 + $0x170] sm:$0xff]  ;;  %v532_v33 = vld [vmem:[%s1270_s26 + $0x178] sm:$0xff]  ;;  %v897_v34 = vpack.c.bf16 %v500_v30, %v499_v29 }
  0x54   : > { %918 = vmatpush3.bf16.msra.mxu1 %v917_v3  ;;  %v929_v35 = vpack.c.bf16 %v532_v33, %v531_v32  ;;  %v483_v37 = vld [vmem:[%s1371_s1 + $0x10] sm:$0x3f] }
  0x55   : > { %920 = vmatprep.subr.bf16.mxu1 %v919_v8 }
  0x56   : > { %890 = vmatpush3.bf16.msra.mxu0 %v889_v14 }
  0x57   : > { %892 = vmatprep.subr.bf16.mxu0 %v891_v16 }
  0x58   : > { %922 = vmatpush3.bf16.msra.mxu1 %v921_v15 }
  0x59   : > { %924 = vmatprep.subr.bf16.mxu1 %v923_v20 }
  0x5a   : > { %894 = vmatpush3.bf16.msra.mxu0 %v893_v26 }
  0x5b   : > { %896 = vmatprep.subr.bf16.mxu0 %v895_v28 }
  0x5c   : > { %926 = vmatpush3.bf16.msra.mxu1 %v925_v27 }
  0x5d   : > { %928 = vmatprep.subr.bf16.mxu1 %v927_v31 }
  0x5e   : > { %898 = vmatpush3.bf16.msra.mxu0 %v897_v34 }
  0x60   : > { %930 = vmatpush3.bf16.msra.mxu1 %v929_v35 }
  0x61   : > { %620 = vmatmul.mubr.f32.vlgmr.msra.gmra.mrb[0].mxu0 %v481_v36 }
  0x63   : > { %690 = vmatmul.mubr.f32.vlgmr.msra.gmra.mrb[0].mxu1 %v483_v37 }
  0xbc   : > { %v553_v39 = vpop.permute.xlu0 %552 }
 0x134   : > { %v829_v38 = vpop.f32.mrb[0].mxu0 }
 0x135   : > { %v830_v40 = vpop.f32.mrb[1].mxu0 }
 0x136   : > { %v864_v41 = vpop.f32.mrb[0].mxu1  ;;  %v831_v42 = vadd.f32 %v830_v40, %v829_v38 }
 0x137   : > { %v865_v43 = vpop.f32.mrb[1].mxu1 }
 0x138   : > { %v866_v44 = vadd.f32 %v865_v43, %v864_v41  ;;  %v622_v45 = vadd.f32 %v831_v42, %v553_v39 }
 0x13a   : > { %v692_v46 = vadd.f32 %v866_v44, %v622_v45 }
 0x13c   : > { %695 = vst [vmem:[%s480_s8] sm:$0x3f] %v692_v46 }
 0x13d PF: > { %s13_s18 = sadd.s32 1, %s1043_s18   ;;  %s1374_s12 = smov %s1023_s13 }
 0x13e   : > { %p10_p12 = scmp.ge.s32.totalorder %s13_s18, 6   ;;  %s1375_s13 = smov %s1117_s25 }
 0x13f   : > { %s1376_s14 = smov %s1035_s16  ;;  %s1377_s15 = smov %s1039_s17 }
 0x140   : > { %s1378_s16 = smov %s1381_s19  ;;  %s1379_s17 = smov %s1385_s20 }
 0x141   :  { %12 = sbr.rel (!%p10_p12) target bundleno = 4 (0x4), region = 105 }

</bundles_post_ra>
